<compile_context>
chip_gen: v7x
topology: tpu7x:2x2x1
jax: 0.10.0
libtpu: 0.0.40
codegen_flags: <defaults>
</compile_context>

<pallas_src>
import functools

import jax
import jax.numpy as jnp
from jax.experimental import pallas as pl
from jax.experimental.pallas import tpu as pltpu

F_IN, HID, OUT = 1000, 500, 4          # logical head dims
F_IN_PAD, HID_PAD, OUT_PAD = 1024, 512, 128  # lane-aligned padded dims


def _round_up(x, m):
    return (x + m - 1) // m * m


# ---------------------------------------------------------------------------
# Kernel: out_tile = relu(x_tile @ W1 + b1) @ W2' + b2'   (BN/Dropout folded)
# ---------------------------------------------------------------------------
def head_kernel(x_ref, w1_ref, b1_ref, w2_ref, b2_ref, o_ref):
    # Linear(1000 -> 500): bf16 operands on the MXU, f32 accumulation.
    h = jnp.dot(x_ref[...], w1_ref[...], preferred_element_type=jnp.float32)
    h = h + b1_ref[...]
    # ReLU (f32 on the VPU).
    h = jnp.maximum(h, 0.0)
    # BatchNorm1d (eval) + Dropout (eval) are folded into w2/b2 at prep time.
    # Linear(500 -> 4), padded to 128 output lanes for a lane-dense store.
    out = jnp.dot(h.astype(jnp.bfloat16), w2_ref[...],
                  preferred_element_type=jnp.float32)
    o_ref[...] = out + b2_ref[...]


# ---------------------------------------------------------------------------
# One-time parameter prep (fold BN, pad to lane-aligned shapes, cast to bf16).
# ---------------------------------------------------------------------------
def prepare_params(params):
    w1, b1, bn_scale, bn_shift, w2, b2 = params
    # Fold eval-mode BN:  (relu(xW1+b1)*s + t) @ W2 + b2
    #                   == relu(xW1+b1) @ (s^T * W2) + (t @ W2 + b2)
    w2_folded = bn_scale.reshape(-1, 1) * w2          # (HID, OUT)
    b2_folded = bn_shift @ w2 + b2                    # (1, OUT)

    w1p = jnp.zeros((F_IN_PAD, HID_PAD), jnp.float32).at[:F_IN, :HID].set(w1)
    b1p = jnp.zeros((1, HID_PAD), jnp.float32).at[:, :HID].set(b1)
    w2p = jnp.zeros((HID_PAD, OUT_PAD), jnp.float32).at[:HID, :OUT].set(w2_folded)
    b2p = jnp.zeros((1, OUT_PAD), jnp.float32).at[:, :OUT].set(b2_folded)

    # Matmul operands in bf16 (MXU-native); bias epilogues stay f32.
    return (w1p.astype(jnp.bfloat16), b1p, w2p.astype(jnp.bfloat16), b2p)


# ---------------------------------------------------------------------------
# Wrapper: pads the batch, tiles it over a 1-D parallel grid.
# ---------------------------------------------------------------------------
@functools.partial(jax.jit, static_argnames=("tile_b",))
def net_head_forward(x, prepped, *, tile_b=512):
    """x: (B, 1000) float32 features (output of the resnet101 backbone)."""
    B = x.shape[0]
    w1, b1, w2, b2 = prepped

    # Collapse to one grid step for small B; otherwise 512-row tiles
    # (multiple of 8 sublanes / 128+256 MXU rows, well inside scoped VMEM).
    tb = min(tile_b, _round_up(B, 8))
    b_pad = _round_up(B, tb)

    xp = jnp.zeros((b_pad, F_IN_PAD), jnp.bfloat16)
    xp = xp.at[:B, :F_IN].set(x.astype(jnp.bfloat16))

    grid = (b_pad // tb,)
    out = pl.pallas_call(
        head_kernel,
        out_shape=jax.ShapeDtypeStruct((b_pad, OUT_PAD), jnp.float32),
        grid_spec=pltpu.PrefetchScalarGridSpec(
            num_scalar_prefetch=0,
            grid=grid,
            in_specs=[
                pl.BlockSpec((tb, F_IN_PAD), lambda i: (i, 0)),       # x tile
                pl.BlockSpec((F_IN_PAD, HID_PAD), lambda i: (0, 0)),  # W1 (resident)
                pl.BlockSpec((1, HID_PAD), lambda i: (0, 0)),         # b1
                pl.BlockSpec((HID_PAD, OUT_PAD), lambda i: (0, 0)),   # W2' (BN folded)
                pl.BlockSpec((1, OUT_PAD), lambda i: (0, 0)),         # b2'
            ],
            out_specs=pl.BlockSpec((tb, OUT_PAD), lambda i: (i, 0)),
        ),
        compiler_params=pltpu.CompilerParams(
            dimension_semantics=("parallel",)),
    )(xp, w1, b1, w2, b2)

    return out[:B, :OUT]


# ---------------------------------------------------------------------------
# Synthetic parameters + pure-JAX references.
# ---------------------------------------------------------------------------
def init_params(key):
    """Deterministic synthetic parameters matching fc1's shapes."""
    k1, k2, k3, k4, k5, k6, k7, k8 = jax.random.split(key, 8)
    # Linear(1000, 500): torch weight (500, 1000) -> stored transposed (1000, 500)
    w1 = jax.random.normal(k1, (F_IN, HID), jnp.float32) * 0.02
    b1 = jax.random.normal(k2, (1, HID), jnp.float32) * 0.02
    # BatchNorm1d(500) eval-mode parameters / running stats
    gamma = 1.0 + 0.1 * jax.random.normal(k3, (1, HID), jnp.float32)
    beta = 0.1 * jax.random.normal(k4, (1, HID), jnp.float32)
    running_mean = 0.1 * jax.random.normal(k5, (1, HID), jnp.float32)
    running_var = 1.0 + 0.1 * jax.random.uniform(k6, (1, HID), jnp.float32)
    eps = 1e-5
    bn_scale = gamma / jnp.sqrt(running_var + eps)
    bn_shift = beta - running_mean * bn_scale
    # Linear(500, 4): torch weight (4, 500) -> stored transposed (500, 4)
    w2 = jax.random.normal(k7, (HID, OUT), jnp.float32) * 0.05
    b2 = jax.random.normal(k8, (1, OUT), jnp.float32) * 0.05
    return (w1, b1, bn_scale, bn_shift, w2, b2)


def reference_forward_f32(x, params):
    """Full-precision semantic reference of the head (eval mode)."""
    w1, b1, bn_scale, bn_shift, w2, b2 = params
    h = jnp.maximum(x @ w1 + b1, 0.0)
    h = h * bn_scale + bn_shift
    return h @ w2 + b2


def reference_forward_prepped(x, prepped):
    """Reference using the same bf16/padded params as the kernel (tight check)."""
    w1, b1, w2, b2 = prepped
    B = x.shape[0]
    xb = jnp.zeros((B, F_IN_PAD), jnp.bfloat16).at[:, :F_IN].set(
        x.astype(jnp.bfloat16))
    h = jnp.dot(xb, w1, preferred_element_type=jnp.float32) + b1
    h = jnp.maximum(h, 0.0)
    out = jnp.dot(h.astype(jnp.bfloat16), w2,
                  preferred_element_type=jnp.float32) + b2
    return out[:, :OUT]


if __name__ == "__main__":
    key = jax.random.PRNGKey(0)
    kx, kp = jax.random.split(key)

    B = 8
    # Synthetic stand-in for resnet101(x) output: (B, 1000) feature vectors.
    x = jax.random.normal(kx, (B, F_IN), jnp.float32)
    params = init_params(kp)
    prepped = prepare_params(params)

    out = net_head_forward(x, prepped)
    out = jax.block_until_ready(out)
    assert out.shape == (B, OUT)

    # Tight check against a reference using identical bf16/padded params.
    ref_bf16 = reference_forward_prepped(x, prepped)
    assert jnp.allclose(out, ref_bf16, atol=5e-3, rtol=5e-3), \
        float(jnp.max(jnp.abs(out - ref_bf16)))

    # Looser check against the full-precision f32 module semantics.
    ref_f32 = reference_forward_f32(x, params)
    assert jnp.allclose(out, ref_f32, atol=1e-1, rtol=1e-1), \
        float(jnp.max(jnp.abs(out - ref_f32)))

    print("KERNEL_OK")
</pallas_src>

<mosaic_0001>
module attributes {stable_mosaic.version = 11 : i64} {
  func.func @head_kernel(%arg0: i32, %arg1: memref<8x1024xbf16, #tpu.memory_space<vmem>>, %arg2: memref<1024x512xbf16, #tpu.memory_space<vmem>>, %arg3: memref<1x512xf32, #tpu.memory_space<vmem>>, %arg4: memref<512x128xbf16, #tpu.memory_space<vmem>>, %arg5: memref<1x128xf32, #tpu.memory_space<vmem>>, %arg6: memref<8x128xf32, #tpu.memory_space<vmem>>) attributes {dimension_semantics = [#tpu.dimension_semantics<parallel>], iteration_bounds = array<i64: 1>, scalar_prefetch = 0 : i64, scratch_operands = 0 : i64, tpu.core_type = #tpu.core_type<tc>, window_params = [{transform_indices = @transform_0, window_bounds = array<i64: 8, 1024>}, {pipeline_mode = #tpu.pipeline_mode<synchronous>, transform_indices = @transform_1, window_bounds = array<i64: 1024, 512>}, {pipeline_mode = #tpu.pipeline_mode<synchronous>, transform_indices = @transform_2, window_bounds = array<i64: 1, 512>}, {pipeline_mode = #tpu.pipeline_mode<synchronous>, transform_indices = @transform_3, window_bounds = array<i64: 512, 128>}, {pipeline_mode = #tpu.pipeline_mode<synchronous>, transform_indices = @transform_4, window_bounds = array<i64: 1, 128>}, {transform_indices = @transform_5, window_bounds = array<i64: 8, 128>}]} {
    %c0 = arith.constant 0 : index
    %c0_0 = arith.constant 0 : index
    %0 = vector.load %arg1[%c0, %c0_0] : memref<8x1024xbf16, #tpu.memory_space<vmem>>, vector<8x1024xbf16>
    %c0_1 = arith.constant 0 : index
    %c0_2 = arith.constant 0 : index
    %1 = vector.load %arg2[%c0_1, %c0_2] : memref<1024x512xbf16, #tpu.memory_space<vmem>>, vector<1024x512xbf16>
    %cst = arith.constant dense<0.000000e+00> : vector<8x512xf32>
    %2 = tpu.matmul %0, %1, %cst {dimension_numbers = #tpu.dot_dimension_numbers<[1], [0], [0], [1], [0, 0, 1, 1], [], []>} : vector<8x1024xbf16>, vector<1024x512xbf16>, vector<8x512xf32> -> vector<8x512xf32>
    %c0_3 = arith.constant 0 : index
    %c0_4 = arith.constant 0 : index
    %3 = vector.load %arg3[%c0_3, %c0_4] : memref<1x512xf32, #tpu.memory_space<vmem>>, vector<1x512xf32>
    %4 = vector.broadcast %3 : vector<1x512xf32> to vector<8x512xf32>
    %5 = arith.addf %2, %4 : vector<8x512xf32>
    %cst_5 = arith.constant 0.000000e+00 : f32
    %6 = vector.broadcast %cst_5 : f32 to vector<8x512xf32>
    %7 = arith.maximumf %5, %6 : vector<8x512xf32>
    %8 = arith.truncf %7 : vector<8x512xf32> to vector<8x512xbf16>
    %c0_6 = arith.constant 0 : index
    %c0_7 = arith.constant 0 : index
    %9 = vector.load %arg4[%c0_6, %c0_7] : memref<512x128xbf16, #tpu.memory_space<vmem>>, vector<512x128xbf16>
    %cst_8 = arith.constant dense<0.000000e+00> : vector<8x128xf32>
    %10 = tpu.matmul %8, %9, %cst_8 {dimension_numbers = #tpu.dot_dimension_numbers<[1], [0], [0], [1], [0, 0, 1, 1], [], []>} : vector<8x512xbf16>, vector<512x128xbf16>, vector<8x128xf32> -> vector<8x128xf32>
    %c0_9 = arith.constant 0 : index
    %c0_10 = arith.constant 0 : index
    %11 = vector.load %arg5[%c0_9, %c0_10] : memref<1x128xf32, #tpu.memory_space<vmem>>, vector<1x128xf32>
    %12 = vector.broadcast %11 : vector<1x128xf32> to vector<8x128xf32>
    %13 = arith.addf %10, %12 : vector<8x128xf32>
    %c0_11 = arith.constant 0 : index
    %c0_12 = arith.constant 0 : index
    %14 = vector.load %arg6[%c0_11, %c0_12] : memref<8x128xf32, #tpu.memory_space<vmem>>, vector<8x128xf32>
    tpu.vector_store %arg6[%c0_11, %c0_12], %13 {strides = array<i32>} : memref<8x128xf32, #tpu.memory_space<vmem>>, vector<8x128xf32>,
    return
  }
  func.func @transform_0(%arg0: i32) -> (i32, i32) {
    %c0_i32 = arith.constant 0 : i32
    %c0_i32_0 = arith.constant 0 : i32
    return %arg0, %c0_i32 : i32, i32
  }
  func.func @transform_1(%arg0: i32) -> (i32, i32) {
    %c0_i32 = arith.constant 0 : i32
    %c0_i32_0 = arith.constant 0 : i32
    %c0_i32_1 = arith.constant 0 : i32
    return %c0_i32, %c0_i32_0 : i32, i32
  }
  func.func @transform_2(%arg0: i32) -> (i32, i32) {
    %c0_i32 = arith.constant 0 : i32
    %c0_i32_0 = arith.constant 0 : i32
    %c0_i32_1 = arith.constant 0 : i32
    return %c0_i32, %c0_i32_0 : i32, i32
  }
  func.func @transform_3(%arg0: i32) -> (i32, i32) {
    %c0_i32 = arith.constant 0 : i32
    %c0_i32_0 = arith.constant 0 : i32
    %c0_i32_1 = arith.constant 0 : i32
    return %c0_i32, %c0_i32_0 : i32, i32
  }
  func.func @transform_4(%arg0: i32) -> (i32, i32) {
    %c0_i32 = arith.constant 0 : i32
    %c0_i32_0 = arith.constant 0 : i32
    %c0_i32_1 = arith.constant 0 : i32
    return %c0_i32, %c0_i32_0 : i32, i32
  }
  func.func @transform_5(%arg0: i32) -> (i32, i32) {
    %c0_i32 = arith.constant 0 : i32
    %c0_i32_0 = arith.constant 0 : i32
    return %arg0, %c0_i32 : i32, i32
  }
}

</mosaic_0001>

<bundles_post_ra>
// kernel: net_head_forward.1
= control target key start
LH: loop header
LB: loop body
LE: loop exit
PB: predicated region body
PF: predicated region fallthrough
CT: control target
= control target key end

     0   :  { %10 = vsyncpa [#allocation3], 0  ;;  %s3271_s0 = inlined_call_operand.vmem [shape: bf16[8,1024], index: 0, kind: input, shape index: {}]   ;;  %s3272_s1 = inlined_call_operand.hbm [shape: bf16[1024,512], index: 1, kind: input, shape index: {}]   ;;  %s3273_s2 = inlined_call_operand.vmem [shape: f32[1,512], index: 2, kind: input, shape index: {}]   ;;  %s3274_s3 = inlined_call_operand.hbm [shape: bf16[512,128], index: 3, kind: input, shape index: {}]   ;;  %s3275_s4 = inlined_call_operand.vmem [shape: f32[1,128], index: 4, kind: input, shape index: {}]   ;;  %s3276_s5 = inlined_call_operand.vmem [shape: f32[8,128], index: 5, kind: output, shape index: {}]  }
   0x1   :  { %11 = vsyncpa [#allocation5], 0  ;;  %s3172_s18 = smov [#allocation2]   ;;  %s3124_s22 = scalar_lea.hbm %s3272_s1, 32768 }
   0x2   :  { %s19_s19 = sshll.u32 %s3172_s18, 4  ;;  %p3125_p0 = scmp.ne.s32.totalorder %s3272_s1, %s3124_s22  ;;  %s20_s19 = int_to_ptr.vmem [resolvable:$true] %s19_s19 }
   0x3   :  { %p3128_p1 = scmp.lt.u32.totalorder %s3124_s22, %s3272_s1 }
   0x5   :  { %p3130_p2 = pnand %p3128_p1, %p3125_p0 }
   0x7   :  { %3133 = shalt.err (!%p3130_p2)
}
   0x8   :  { %s3134_s27 = scalar_lea.vmem %s20_s19, 32768  ;;  %p3139_p4 = scmp.lt.s32.totalorder %s20_s19, %s20_s19 }
   0x9   :  { %p3135_p3 = scmp.ne.s32.totalorder %s20_s19, %s3134_s27  ;;  %p3140_p5 = scmp.lt.s32.totalorder %s3134_s27, %s3134_s27 }
   0xb   :  { %p3141_p6 = por %p3140_p5, %p3139_p4 }
   0xd   :  { %p3142_p7 = pnand %p3141_p6, %p3135_p3 }
   0xf   :  { %3145 = shalt.err (!%p3142_p7)
}
  0x10   :  { %s3173_s28 = smov 256   ;;  %s3174_s29 = smov 16  }
  0x11   :  { %25 = dma.hbm_to_vmem [thread:$0]  %s3272_s1, 32768, %s20_s19, [#allocation3], %s3173_s28, %s3173_s28, %s3174_s29  }
  0x12   :  { %s3175_s7 = smov [#allocation4]   ;;  %s3146_s11 = scalar_lea.hbm %s3274_s3, 4096 }
  0x13   :  { %s33_s8 = sshll.u32 %s3175_s7, 4  ;;  %p3147_p8 = scmp.ne.s32.totalorder %s3274_s3, %s3146_s11  ;;  %s34_s8 = int_to_ptr.vmem [resolvable:$true] %s33_s8 }
  0x14   :  { %p3150_p9 = scmp.lt.u32.totalorder %s3146_s11, %s3274_s3 }
  0x16   :  { %p3152_p10 = pnand %p3150_p9, %p3147_p8 }
  0x18   :  { %3155 = shalt.err (!%p3152_p10)
}
  0x19   :  { %s3156_s16 = scalar_lea.vmem %s34_s8, 4096  ;;  %p3161_p12 = scmp.lt.s32.totalorder %s34_s8, %s34_s8 }
  0x1a   :  { %p3157_p11 = scmp.ne.s32.totalorder %s34_s8, %s3156_s16  ;;  %p3162_p13 = scmp.lt.s32.totalorder %s3156_s16, %s3156_s16 }
  0x1c   :  { %p3163_p0 = por %p3162_p13, %p3161_p12 }
  0x1e   :  { %p3164_p1 = pnand %p3163_p0, %p3157_p11 }
  0x20   :  { %3167 = shalt.err (!%p3164_p1)
}
  0x21   :  { %s3176_s1 = smov 64   ;;  %s3177_s17 = smov 4  }
  0x22   :  { %39 = dma.hbm_to_vmem [thread:$0]  %s3274_s3, 4096, %s34_s8, [#allocation5], %s3176_s1, %s3176_s1, %s3177_s17  }
  0x23   :  { %3168 = dma.done.wait [#allocation3], 32768  }
  0x24   :  { %3169 = vsyncadd [#allocation3], 4294934528 }
  0x25   :  { %3170 = dma.done.wait [#allocation5], 4096  }
  0x26   :  { %3171 = vsyncadd [#allocation5], 4294963200  ;;  %v2700_v0 = vld [vmem:[#allocation2 + $0x4] ss:$16 sps:$4 sm:$0xff]   ;;  %v2702_v1 = vld [vmem:[#allocation2 + $0xc] ss:$16 sps:$4 sm:$0xff]  }
  0x27   :  { %1639 = vmatprep.subr.bf16.mxu0 %v2700_v0  ;;  %v2704_v2 = vld [vmem:[#allocation2] ss:$16 sps:$4 sm:$0xff]   ;;  %v2705_v3 = vld [vmem:[#allocation2 + $0x8] ss:$16 sps:$4 sm:$0xff]   ;;  %1803 = vmatprep.subr.bf16.mxu1 %v2702_v1  ;;  %v2706_v4 = vld [vmem:[#allocation2 + $0x24] ss:$16 sps:$4 sm:$0xff]  }
  0x28   :  { %1640 = vmatpush1.bf16.msra.mxu0 %v2704_v2  ;;  %1804 = vmatpush1.bf16.msra.mxu1 %v2705_v3  ;;  %v2708_v5 = vld [vmem:[#allocation2 + $0x2c] ss:$16 sps:$4 sm:$0xff]   ;;  %v2710_v6 = vld [vmem:[#allocation2 + $0x20] ss:$16 sps:$4 sm:$0xff]   ;;  %v2711_v7 = vld [vmem:[#allocation2 + $0x28] ss:$16 sps:$4 sm:$0xff]  }
  0x29   :  { %1641 = vmatprep.subr.bf16.mxu0 %v2706_v4  ;;  %1805 = vmatprep.subr.bf16.mxu1 %v2708_v5  ;;  %v2712_v8 = vld [vmem:[#allocation2 + $0x44] ss:$16 sps:$4 sm:$0xff]   ;;  %v2714_v9 = vld [vmem:[#allocation2 + $0x4c] ss:$16 sps:$4 sm:$0xff]   ;;  %v2716_v10 = vld [vmem:[#allocation2 + $0x40] ss:$16 sps:$4 sm:$0xff]  }
  0x2a   :  { %v2717_v11 = vld [vmem:[#allocation2 + $0x48] ss:$16 sps:$4 sm:$0xff]   ;;  %v2718_v12 = vld [vmem:[#allocation2 + $0x64] ss:$16 sps:$4 sm:$0xff]   ;;  %v2720_v13 = vld [vmem:[#allocation2 + $0x6c] ss:$16 sps:$4 sm:$0xff]  }
  0x2b   :  { %v2722_v14 = vld [vmem:[#allocation2 + $0x60] ss:$16 sps:$4 sm:$0xff]   ;;  %v2723_v15 = vld [vmem:[#allocation2 + $0x68] ss:$16 sps:$4 sm:$0xff]   ;;  %v2724_v16 = vld [vmem:[#allocation2 + $0x84] ss:$16 sps:$4 sm:$0xff]  }
  0x2c   :  { %1642 = vmatpush1.bf16.msra.mxu0 %v2710_v6  ;;  %1806 = vmatpush1.bf16.msra.mxu1 %v2711_v7  ;;  %v2726_v17 = vld [vmem:[#allocation2 + $0x8c] ss:$16 sps:$4 sm:$0xff]   ;;  %v2728_v18 = vld [vmem:[#allocation2 + $0x80] ss:$16 sps:$4 sm:$0xff]   ;;  %v2729_v19 = vld [vmem:[#allocation2 + $0x88] ss:$16 sps:$4 sm:$0xff]  }
  0x2d   :  { %1643 = vmatprep.subr.bf16.mxu0 %v2712_v8  ;;  %1807 = vmatprep.subr.bf16.mxu1 %v2714_v9  ;;  %v2730_v20 = vld [vmem:[#allocation2 + $0xa4] ss:$16 sps:$4 sm:$0xff]   ;;  %v2732_v21 = vld [vmem:[#allocation2 + $0xac] ss:$16 sps:$4 sm:$0xff]   ;;  %v2734_v22 = vld [vmem:[#allocation2 + $0xa0] ss:$16 sps:$4 sm:$0xff]  }
  0x2e   :  { %v2735_v23 = vld [vmem:[#allocation2 + $0xa8] ss:$16 sps:$4 sm:$0xff]   ;;  %v2736_v24 = vld [vmem:[#allocation2 + $0xc4] ss:$16 sps:$4 sm:$0xff]   ;;  %v2738_v25 = vld [vmem:[#allocation2 + $0xcc] ss:$16 sps:$4 sm:$0xff]  }
  0x2f   :  { %v2740_v26 = vld [vmem:[#allocation2 + $0xc0] ss:$16 sps:$4 sm:$0xff]   ;;  %v2741_v27 = vld [vmem:[#allocation2 + $0xc8] ss:$16 sps:$4 sm:$0xff]   ;;  %v2742_v28 = vld [vmem:[#allocation2 + $0xe4] ss:$16 sps:$4 sm:$0xff]  }
  0x30   :  { %1644 = vmatpush1.bf16.msra.mxu0 %v2716_v10  ;;  %1808 = vmatpush1.bf16.msra.mxu1 %v2717_v11  ;;  %v2744_v29 = vld [vmem:[#allocation2 + $0xec] ss:$16 sps:$4 sm:$0xff]   ;;  %v2746_v30 = vld [vmem:[#allocation2 + $0xe0] ss:$16 sps:$4 sm:$0xff]   ;;  %v2747_v31 = vld [vmem:[#allocation2 + $0xe8] ss:$16 sps:$4 sm:$0xff]  }
  0x31   :  { %1645 = vmatprep.subr.bf16.mxu0 %v2718_v12  ;;  %1809 = vmatprep.subr.bf16.mxu1 %v2720_v13  ;;  %v2748_v32 = vld [vmem:[#allocation2 + $0x104] ss:$16 sps:$4 sm:$0xff]   ;;  %v2750_v33 = vld [vmem:[#allocation2 + $0x10c] ss:$16 sps:$4 sm:$0xff]   ;;  %v2752_v34 = vld [vmem:[#allocation2 + $0x100] ss:$16 sps:$4 sm:$0xff]  }
  0x32   :  { %v2753_v35 = vld [vmem:[#allocation2 + $0x108] ss:$16 sps:$4 sm:$0xff]   ;;  %v2754_v36 = vld [vmem:[#allocation2 + $0x124] ss:$16 sps:$4 sm:$0xff]   ;;  %v2756_v37 = vld [vmem:[#allocation2 + $0x12c] ss:$16 sps:$4 sm:$0xff]  }
  0x33   :  { %v2758_v38 = vld [vmem:[#allocation2 + $0x120] ss:$16 sps:$4 sm:$0xff]   ;;  %v2759_v39 = vld [vmem:[#allocation2 + $0x128] ss:$16 sps:$4 sm:$0xff]   ;;  %v2760_v40 = vld [vmem:[#allocation2 + $0x144] ss:$16 sps:$4 sm:$0xff]  }
  0x34   :  { %1646 = vmatpush1.bf16.msra.mxu0 %v2722_v14  ;;  %1810 = vmatpush1.bf16.msra.mxu1 %v2723_v15  ;;  %v2762_v41 = vld [vmem:[#allocation2 + $0x14c] ss:$16 sps:$4 sm:$0xff]   ;;  %v2764_v42 = vld [vmem:[#allocation2 + $0x140] ss:$16 sps:$4 sm:$0xff]   ;;  %v2765_v43 = vld [vmem:[#allocation2 + $0x148] ss:$16 sps:$4 sm:$0xff]  }
  0x35   :  { %1647 = vmatprep.subr.bf16.mxu0 %v2724_v16  ;;  %1811 = vmatprep.subr.bf16.mxu1 %v2726_v17  ;;  %v2766_v44 = vld [vmem:[#allocation2 + $0x164] ss:$16 sps:$4 sm:$0xff]   ;;  %v2768_v45 = vld [vmem:[#allocation2 + $0x16c] ss:$16 sps:$4 sm:$0xff]   ;;  %v2770_v47 = vld [vmem:[#allocation2 + $0x160] ss:$16 sps:$4 sm:$0xff]  }
  0x36   :  { %v49_v46 = vld [vmem:[%s3271_s0] sm:$0xff]  ;;  %v2771_v49 = vld [vmem:[#allocation2 + $0x168] ss:$16 sps:$4 sm:$0xff]   ;;  %v2774_v51 = vld [vmem:[#allocation2 + $0x18c] ss:$16 sps:$4 sm:$0xff]  }
  0x37   :  { %v2326_v48 = vcombine.high %v49_v46, %v49_v46  ;;  %v2772_v50 = vld [vmem:[#allocation2 + $0x184] ss:$16 sps:$4 sm:$0xff]   ;;  %v2776_v52 = vld [vmem:[#allocation2 + $0x180] ss:$16 sps:$4 sm:$0xff]   ;;  %v2777_v53 = vld [vmem:[#allocation2 + $0x188] ss:$16 sps:$4 sm:$0xff]   ;;  %v2325_v4 = vcombine.low %v49_v46, %v49_v46 }
  0x38   :  { %1648 = vmatpush1.bf16.msra.mxu0 %v2728_v18  ;;  %1812 = vmatpush1.bf16.msra.mxu1 %v2729_v19  ;;  %v2778_v54 = vld [vmem:[#allocation2 + $0x1a4] ss:$16 sps:$4 sm:$0xff]   ;;  %v2780_v55 = vld [vmem:[#allocation2 + $0x1ac] ss:$16 sps:$4 sm:$0xff]   ;;  %v2782_v56 = vld [vmem:[#allocation2 + $0x1a0] ss:$16 sps:$4 sm:$0xff]  }
  0x39   :  { %1649 = vmatprep.subr.bf16.mxu0 %v2730_v20  ;;  %1813 = vmatprep.subr.bf16.mxu1 %v2732_v21  ;;  %v2783_v57 = vld [vmem:[#allocation2 + $0x1a8] ss:$16 sps:$4 sm:$0xff]   ;;  %v2784_v58 = vld [vmem:[#allocation2 + $0x1c4] ss:$16 sps:$4 sm:$0xff]   ;;  %v2786_v59 = vld [vmem:[#allocation2 + $0x1cc] ss:$16 sps:$4 sm:$0xff]  }
  0x3a   :  { %1671 = vmatprep.mubr.bf16.mxu0 %v2326_v48  ;;  %1835 = vmatprep.mubr.bf16.mxu1 %v2326_v48  ;;  %v2788_v60 = vld [vmem:[#allocation2 + $0x1c0] ss:$16 sps:$4 sm:$0xff]   ;;  %v2789_v61 = vld [vmem:[#allocation2 + $0x1c8] ss:$16 sps:$4 sm:$0xff]   ;;  %v2790_v62 = vld [vmem:[#allocation2 + $0x1e4] ss:$16 sps:$4 sm:$0xff]  }
  0x3b   :  { %v2792_v63 = vld [vmem:[#allocation2 + $0x1ec] ss:$16 sps:$4 sm:$0xff]   ;;  %v2794_v0 = vld [vmem:[#allocation2 + $0x1e0] ss:$16 sps:$4 sm:$0xff]   ;;  %v2795_v1 = vld [vmem:[#allocation2 + $0x1e8] ss:$16 sps:$4 sm:$0xff]  }
  0x3c   :  { %1650 = vmatpush1.bf16.msra.mxu0 %v2734_v22  ;;  %1814 = vmatpush1.bf16.msra.mxu1 %v2735_v23  ;;  %v2800_v2 = vld [vmem:[#allocation2 + $0x204] ss:$16 sps:$4 sm:$0xff]   ;;  %v2803_v3 = vld [vmem:[#allocation2 + $0x20c] ss:$16 sps:$4 sm:$0xff]   ;;  %v2798_v5 = vld [vmem:[#allocation2 + $0x200] ss:$16 sps:$4 sm:$0xff]  }
  0x3d   :  { %1651 = vmatprep.subr.bf16.mxu0 %v2736_v24  ;;  %1815 = vmatprep.subr.bf16.mxu1 %v2738_v25  ;;  %v2801_v6 = vld [vmem:[#allocation2 + $0x208] ss:$16 sps:$4 sm:$0xff]   ;;  %v2806_v7 = vld [vmem:[#allocation2 + $0x224] ss:$16 sps:$4 sm:$0xff]   ;;  %v2809_v8 = vld [vmem:[#allocation2 + $0x22c] ss:$16 sps:$4 sm:$0xff]  }
  0x3e   :  { %v2804_v9 = vld [vmem:[#allocation2 + $0x220] ss:$16 sps:$4 sm:$0xff]   ;;  %v2807_v10 = vld [vmem:[#allocation2 + $0x228] ss:$16 sps:$4 sm:$0xff]   ;;  %v2812_v11 = vld [vmem:[#allocation2 + $0x244] ss:$16 sps:$4 sm:$0xff]  }
  0x3f   :  { %v2815_v12 = vld [vmem:[#allocation2 + $0x24c] ss:$16 sps:$4 sm:$0xff]   ;;  %v2810_v13 = vld [vmem:[#allocation2 + $0x240] ss:$16 sps:$4 sm:$0xff]   ;;  %v2813_v14 = vld [vmem:[#allocation2 + $0x248] ss:$16 sps:$4 sm:$0xff]  }
  0x40   :  { %1652 = vmatpush1.bf16.msra.mxu0 %v2740_v26  ;;  %1816 = vmatpush1.bf16.msra.mxu1 %v2741_v27  ;;  %v2818_v15 = vld [vmem:[#allocation2 + $0x264] ss:$16 sps:$4 sm:$0xff]   ;;  %v2821_v16 = vld [vmem:[#allocation2 + $0x26c] ss:$16 sps:$4 sm:$0xff]   ;;  %v2816_v17 = vld [vmem:[#allocation2 + $0x260] ss:$16 sps:$4 sm:$0xff]  }
  0x41   :  { %1653 = vmatprep.subr.bf16.mxu0 %v2742_v28  ;;  %1817 = vmatprep.subr.bf16.mxu1 %v2744_v29  ;;  %v2819_v18 = vld [vmem:[#allocation2 + $0x268] ss:$16 sps:$4 sm:$0xff]   ;;  %v2824_v19 = vld [vmem:[#allocation2 + $0x284] ss:$16 sps:$4 sm:$0xff]   ;;  %v2827_v20 = vld [vmem:[#allocation2 + $0x28c] ss:$16 sps:$4 sm:$0xff]  }
  0x42   :  { %v2822_v21 = vld [vmem:[#allocation2 + $0x280] ss:$16 sps:$4 sm:$0xff]   ;;  %v2825_v22 = vld [vmem:[#allocation2 + $0x288] ss:$16 sps:$4 sm:$0xff]   ;;  %v2830_v23 = vld [vmem:[#allocation2 + $0x2a4] ss:$16 sps:$4 sm:$0xff]  }
  0x43   :  { %v2833_v24 = vld [vmem:[#allocation2 + $0x2ac] ss:$16 sps:$4 sm:$0xff]   ;;  %v2828_v25 = vld [vmem:[#allocation2 + $0x2a0] ss:$16 sps:$4 sm:$0xff]   ;;  %v2831_v26 = vld [vmem:[#allocation2 + $0x2a8] ss:$16 sps:$4 sm:$0xff]  }
  0x44   :  { %1654 = vmatpush1.bf16.msra.mxu0 %v2746_v30  ;;  %1818 = vmatpush1.bf16.msra.mxu1 %v2747_v31  ;;  %v2836_v27 = vld [vmem:[#allocation2 + $0x2c4] ss:$16 sps:$4 sm:$0xff]   ;;  %v2839_v28 = vld [vmem:[#allocation2 + $0x2cc] ss:$16 sps:$4 sm:$0xff]   ;;  %v2834_v31 = vld [vmem:[#allocation2 + $0x2c0] ss:$16 sps:$4 sm:$0xff]  }
  0x45   :  { %1655 = vmatprep.subr.bf16.mxu0 %v2748_v32  ;;  %1819 = vmatprep.subr.bf16.mxu1 %v2750_v33  ;;  %v3238_v29 = vld [vmem:[%s3271_s0 + $0x8] sm:$0xff]  ;;  %v2842_v33 = vld [vmem:[#allocation2 + $0x2e4] ss:$16 sps:$4 sm:$0xff]  }
  0x46   :  { %v2328_v30 = vcombine.high %v3238_v29, %v3238_v29  ;;  %v2837_v32 = vld [vmem:[#allocation2 + $0x2c8] ss:$16 sps:$4 sm:$0xff]   ;;  %v2863_v46 = vld [vmem:[#allocation2 + $0x34c] ss:$16 sps:$4 sm:$0xff]  }
  0x47   :  { %v2861_v48 = vld [vmem:[#allocation2 + $0x348] ss:$16 sps:$4 sm:$0xff]  }
  0x48   :  { %1656 = vmatpush1.bf16.msra.mxu0 %v2752_v34  ;;  %1820 = vmatpush1.bf16.msra.mxu1 %v2753_v35  ;;  %v2845_v34 = vld [vmem:[#allocation2 + $0x2ec] ss:$16 sps:$4 sm:$0xff]   ;;  %v2840_v35 = vld [vmem:[#allocation2 + $0x2e0] ss:$16 sps:$4 sm:$0xff]  }
  0x49   :  { %1657 = vmatprep.subr.bf16.mxu0 %v2754_v36  ;;  %1821 = vmatprep.subr.bf16.mxu1 %v2756_v37  ;;  %v2843_v36 = vld [vmem:[#allocation2 + $0x2e8] ss:$16 sps:$4 sm:$0xff]   ;;  %v2848_v37 = vld [vmem:[#allocation2 + $0x304] ss:$16 sps:$4 sm:$0xff]  }
  0x4c   :  { %1658 = vmatpush1.bf16.msra.mxu0 %v2758_v38  ;;  %1822 = vmatpush1.bf16.msra.mxu1 %v2759_v39  ;;  %v2851_v38 = vld [vmem:[#allocation2 + $0x30c] ss:$16 sps:$4 sm:$0xff]   ;;  %v2846_v39 = vld [vmem:[#allocation2 + $0x300] ss:$16 sps:$4 sm:$0xff]  }
  0x4d   :  { %1659 = vmatprep.subr.bf16.mxu0 %v2760_v40  ;;  %1823 = vmatprep.subr.bf16.mxu1 %v2762_v41  ;;  %v2849_v40 = vld [vmem:[#allocation2 + $0x308] ss:$16 sps:$4 sm:$0xff]   ;;  %v2854_v41 = vld [vmem:[#allocation2 + $0x324] ss:$16 sps:$4 sm:$0xff]  }
  0x50   :  { %1660 = vmatpush1.bf16.msra.mxu0 %v2764_v42  ;;  %1824 = vmatpush1.bf16.msra.mxu1 %v2765_v43  ;;  %v2857_v42 = vld [vmem:[#allocation2 + $0x32c] ss:$16 sps:$4 sm:$0xff]   ;;  %v2852_v43 = vld [vmem:[#allocation2 + $0x320] ss:$16 sps:$4 sm:$0xff]  }
  0x51   :  { %1661 = vmatprep.subr.bf16.mxu0 %v2766_v44  ;;  %1825 = vmatprep.subr.bf16.mxu1 %v2768_v45  ;;  %v2855_v44 = vld [vmem:[#allocation2 + $0x328] ss:$16 sps:$4 sm:$0xff]   ;;  %v2860_v45 = vld [vmem:[#allocation2 + $0x344] ss:$16 sps:$4 sm:$0xff]  }
  0x54   :  { %1662 = vmatpush1.bf16.msra.mxu0 %v2770_v47  ;;  %1826 = vmatpush1.bf16.msra.mxu1 %v2771_v49  ;;  %v2858_v47 = vld [vmem:[#allocation2 + $0x340] ss:$16 sps:$4 sm:$0xff]   ;;  %v2866_v49 = vld [vmem:[#allocation2 + $0x364] ss:$16 sps:$4 sm:$0xff]  }
  0x55   :  { %1663 = vmatprep.subr.bf16.mxu0 %v2772_v50  ;;  %1827 = vmatprep.subr.bf16.mxu1 %v2774_v51  ;;  %v2869_v50 = vld [vmem:[#allocation2 + $0x36c] ss:$16 sps:$4 sm:$0xff]   ;;  %v2864_v51 = vld [vmem:[#allocation2 + $0x360] ss:$16 sps:$4 sm:$0xff]  }
  0x58   :  { %1664 = vmatpush1.bf16.msra.mxu0 %v2776_v52  ;;  %1828 = vmatpush1.bf16.msra.mxu1 %v2777_v53  ;;  %v2867_v52 = vld [vmem:[#allocation2 + $0x368] ss:$16 sps:$4 sm:$0xff]   ;;  %v2872_v53 = vld [vmem:[#allocation2 + $0x384] ss:$16 sps:$4 sm:$0xff]  }
  0x59   :  { %1665 = vmatprep.subr.bf16.mxu0 %v2778_v54  ;;  %1829 = vmatprep.subr.bf16.mxu1 %v2780_v55  ;;  %v2875_v54 = vld [vmem:[#allocation2 + $0x38c] ss:$16 sps:$4 sm:$0xff]   ;;  %v2870_v55 = vld [vmem:[#allocation2 + $0x380] ss:$16 sps:$4 sm:$0xff]  }
  0x5c   :  { %1666 = vmatpush1.bf16.msra.mxu0 %v2782_v56  ;;  %1830 = vmatpush1.bf16.msra.mxu1 %v2783_v57  ;;  %v2873_v56 = vld [vmem:[#allocation2 + $0x388] ss:$16 sps:$4 sm:$0xff]   ;;  %v2878_v57 = vld [vmem:[#allocation2 + $0x3a4] ss:$16 sps:$4 sm:$0xff]  }
  0x5d   :  { %1667 = vmatprep.subr.bf16.mxu0 %v2784_v58  ;;  %1831 = vmatprep.subr.bf16.mxu1 %v2786_v59  ;;  %v2881_v58 = vld [vmem:[#allocation2 + $0x3ac] ss:$16 sps:$4 sm:$0xff]   ;;  %v2876_v59 = vld [vmem:[#allocation2 + $0x3a0] ss:$16 sps:$4 sm:$0xff]  }
  0x60   :  { %1668 = vmatpush1.bf16.msra.mxu0 %v2788_v60  ;;  %1832 = vmatpush1.bf16.msra.mxu1 %v2789_v61  ;;  %v2879_v60 = vld [vmem:[#allocation2 + $0x3a8] ss:$16 sps:$4 sm:$0xff]   ;;  %v2884_v61 = vld [vmem:[#allocation2 + $0x3c4] ss:$16 sps:$4 sm:$0xff]  }
  0x61   :  { %1669 = vmatprep.subr.bf16.mxu0 %v2790_v62  ;;  %1833 = vmatprep.subr.bf16.mxu1 %v2792_v63  ;;  %v2887_v62 = vld [vmem:[#allocation2 + $0x3cc] ss:$16 sps:$4 sm:$0xff]   ;;  %v2882_v63 = vld [vmem:[#allocation2 + $0x3c0] ss:$16 sps:$4 sm:$0xff]  }
  0x64   :  { %1670 = vmatpush1.bf16.msra.mxu0 %v2794_v0  ;;  %1834 = vmatpush1.bf16.msra.mxu1 %v2795_v1  ;;  %v2885_v0 = vld [vmem:[#allocation2 + $0x3c8] ss:$16 sps:$4 sm:$0xff]   ;;  %v2890_v1 = vld [vmem:[#allocation2 + $0x3e4] ss:$16 sps:$4 sm:$0xff]  }
  0x65   :  { %1680 = vmatprep.subr.bf16.mxu0 %v2800_v2  ;;  %1844 = vmatprep.subr.bf16.mxu1 %v2803_v3  ;;  %v2893_v2 = vld [vmem:[#allocation2 + $0x3ec] ss:$16 sps:$4 sm:$0xff]   ;;  %v2888_v3 = vld [vmem:[#allocation2 + $0x3e0] ss:$16 sps:$4 sm:$0xff]  }
  0x67   :  { %1672 = vmatmul.mubr.bf16.vlgmr.msra.gmra.mrb[0].mxu0 %v2325_v4  ;;  %1836 = vmatmul.mubr.bf16.vlgmr.msra.gmra.mrb[0].mxu1 %v2325_v4  ;;  %v2891_v4 = vld [vmem:[#allocation2 + $0x3e8] ss:$16 sps:$4 sm:$0xff]  }
  0x68   :  { %1681 = vmatpush1.bf16.msra.mxu0 %v2798_v5  ;;  %1845 = vmatpush1.bf16.msra.mxu1 %v2801_v6  ;;  %v2898_v5 = vld [vmem:[#allocation2 + $0x404] ss:$16 sps:$4 sm:$0xff]   ;;  %v2901_v6 = vld [vmem:[#allocation2 + $0x40c] ss:$16 sps:$4 sm:$0xff]  }
  0x69   :  { %1682 = vmatprep.subr.bf16.mxu0 %v2806_v7  ;;  %1846 = vmatprep.subr.bf16.mxu1 %v2809_v8  ;;  %v2327_v7 = vcombine.low %v3238_v29, %v3238_v29  ;;  %v2896_v8 = vld [vmem:[#allocation2 + $0x400] ss:$16 sps:$4 sm:$0xff]   ;;  %v2931_v29 = vld [vmem:[#allocation2 + $0x4ac] ss:$16 sps:$4 sm:$0xff]  }
  0x6a   :  { %1712 = vmatprep.mubr.bf16.mxu0 %v2328_v30  ;;  %1876 = vmatprep.mubr.bf16.mxu1 %v2328_v30  ;;  %v2926_v30 = vld [vmem:[#allocation2 + $0x4a0] ss:$16 sps:$4 sm:$0xff]  }
  0x6c   :  { %1683 = vmatpush1.bf16.msra.mxu0 %v2804_v9  ;;  %1847 = vmatpush1.bf16.msra.mxu1 %v2807_v10  ;;  %v2899_v9 = vld [vmem:[#allocation2 + $0x408] ss:$16 sps:$4 sm:$0xff]   ;;  %v2904_v10 = vld [vmem:[#allocation2 + $0x424] ss:$16 sps:$4 sm:$0xff]  }
  0x6d   :  { %1684 = vmatprep.subr.bf16.mxu0 %v2812_v11  ;;  %1848 = vmatprep.subr.bf16.mxu1 %v2815_v12  ;;  %v3247_v11 = vld [vmem:[%s3271_s0 + $0x10] sm:$0xff]  ;;  %v2907_v12 = vld [vmem:[#allocation2 + $0x42c] ss:$16 sps:$4 sm:$0xff]  }
  0x70   :  { %1685 = vmatpush1.bf16.msra.mxu0 %v2810_v13  ;;  %1849 = vmatpush1.bf16.msra.mxu1 %v2813_v14  ;;  %v2330_v13 = vcombine.high %v3247_v11, %v3247_v11  ;;  %v2902_v14 = vld [vmem:[#allocation2 + $0x420] ss:$16 sps:$4 sm:$0xff]  }
  0x71   :  { %1686 = vmatprep.subr.bf16.mxu0 %v2818_v15  ;;  %1850 = vmatprep.subr.bf16.mxu1 %v2821_v16  ;;  %v2905_v15 = vld [vmem:[#allocation2 + $0x428] ss:$16 sps:$4 sm:$0xff]   ;;  %v2910_v16 = vld [vmem:[#allocation2 + $0x444] ss:$16 sps:$4 sm:$0xff]  }
  0x74   :  { %1687 = vmatpush1.bf16.msra.mxu0 %v2816_v17  ;;  %1851 = vmatpush1.bf16.msra.mxu1 %v2819_v18  ;;  %v2913_v17 = vld [vmem:[#allocation2 + $0x44c] ss:$16 sps:$4 sm:$0xff]   ;;  %v2908_v18 = vld [vmem:[#allocation2 + $0x440] ss:$16 sps:$4 sm:$0xff]  }
  0x75   :  { %1688 = vmatprep.subr.bf16.mxu0 %v2824_v19  ;;  %1852 = vmatprep.subr.bf16.mxu1 %v2827_v20  ;;  %v2911_v19 = vld [vmem:[#allocation2 + $0x448] ss:$16 sps:$4 sm:$0xff]   ;;  %v2916_v20 = vld [vmem:[#allocation2 + $0x464] ss:$16 sps:$4 sm:$0xff]  }
  0x78   :  { %1689 = vmatpush1.bf16.msra.mxu0 %v2822_v21  ;;  %1853 = vmatpush1.bf16.msra.mxu1 %v2825_v22  ;;  %v2919_v21 = vld [vmem:[#allocation2 + $0x46c] ss:$16 sps:$4 sm:$0xff]   ;;  %v2914_v22 = vld [vmem:[#allocation2 + $0x460] ss:$16 sps:$4 sm:$0xff]  }
  0x79   :  { %1690 = vmatprep.subr.bf16.mxu0 %v2830_v23  ;;  %1854 = vmatprep.subr.bf16.mxu1 %v2833_v24  ;;  %v2917_v23 = vld [vmem:[#allocation2 + $0x468] ss:$16 sps:$4 sm:$0xff]   ;;  %v2922_v24 = vld [vmem:[#allocation2 + $0x484] ss:$16 sps:$4 sm:$0xff]  }
  0x7c   :  { %1691 = vmatpush1.bf16.msra.mxu0 %v2828_v25  ;;  %1855 = vmatpush1.bf16.msra.mxu1 %v2831_v26  ;;  %v2925_v25 = vld [vmem:[#allocation2 + $0x48c] ss:$16 sps:$4 sm:$0xff]   ;;  %v2920_v26 = vld [vmem:[#allocation2 + $0x480] ss:$16 sps:$4 sm:$0xff]  }
  0x7d   :  { %1692 = vmatprep.subr.bf16.mxu0 %v2836_v27  ;;  %1856 = vmatprep.subr.bf16.mxu1 %v2839_v28  ;;  %v2923_v27 = vld [vmem:[#allocation2 + $0x488] ss:$16 sps:$4 sm:$0xff]   ;;  %v2928_v28 = vld [vmem:[#allocation2 + $0x4a4] ss:$16 sps:$4 sm:$0xff]  }
  0x80   :  { %1693 = vmatpush1.bf16.msra.mxu0 %v2834_v31  ;;  %1857 = vmatpush1.bf16.msra.mxu1 %v2837_v32  ;;  %v2929_v31 = vld [vmem:[#allocation2 + $0x4a8] ss:$16 sps:$4 sm:$0xff]   ;;  %v2934_v32 = vld [vmem:[#allocation2 + $0x4c4] ss:$16 sps:$4 sm:$0xff]  }
  0x81   :  { %1694 = vmatprep.subr.bf16.mxu0 %v2842_v33  ;;  %1858 = vmatprep.subr.bf16.mxu1 %v2845_v34  ;;  %v2937_v33 = vld [vmem:[#allocation2 + $0x4cc] ss:$16 sps:$4 sm:$0xff]   ;;  %v2932_v34 = vld [vmem:[#allocation2 + $0x4c0] ss:$16 sps:$4 sm:$0xff]  }
  0x84   :  { %1695 = vmatpush1.bf16.msra.mxu0 %v2840_v35  ;;  %1859 = vmatpush1.bf16.msra.mxu1 %v2843_v36  ;;  %v2935_v35 = vld [vmem:[#allocation2 + $0x4c8] ss:$16 sps:$4 sm:$0xff]   ;;  %v2940_v36 = vld [vmem:[#allocation2 + $0x4e4] ss:$16 sps:$4 sm:$0xff]  }
  0x85   :  { %1696 = vmatprep.subr.bf16.mxu0 %v2848_v37  ;;  %1860 = vmatprep.subr.bf16.mxu1 %v2851_v38  ;;  %v2943_v37 = vld [vmem:[#allocation2 + $0x4ec] ss:$16 sps:$4 sm:$0xff]   ;;  %v2938_v38 = vld [vmem:[#allocation2 + $0x4e0] ss:$16 sps:$4 sm:$0xff]  }
  0x88   :  { %1697 = vmatpush1.bf16.msra.mxu0 %v2846_v39  ;;  %1861 = vmatpush1.bf16.msra.mxu1 %v2849_v40  ;;  %v2941_v39 = vld [vmem:[#allocation2 + $0x4e8] ss:$16 sps:$4 sm:$0xff]   ;;  %v2946_v40 = vld [vmem:[#allocation2 + $0x504] ss:$16 sps:$4 sm:$0xff]  }
  0x89   :  { %1698 = vmatprep.subr.bf16.mxu0 %v2854_v41  ;;  %1862 = vmatprep.subr.bf16.mxu1 %v2857_v42  ;;  %v2949_v41 = vld [vmem:[#allocation2 + $0x50c] ss:$16 sps:$4 sm:$0xff]   ;;  %v2944_v42 = vld [vmem:[#allocation2 + $0x500] ss:$16 sps:$4 sm:$0xff]  }
  0x8c   :  { %1699 = vmatpush1.bf16.msra.mxu0 %v2852_v43  ;;  %1863 = vmatpush1.bf16.msra.mxu1 %v2855_v44  ;;  %v2947_v43 = vld [vmem:[#allocation2 + $0x508] ss:$16 sps:$4 sm:$0xff]   ;;  %v2952_v44 = vld [vmem:[#allocation2 + $0x524] ss:$16 sps:$4 sm:$0xff]  }
  0x8d   :  { %1700 = vmatprep.subr.bf16.mxu0 %v2860_v45  ;;  %1864 = vmatprep.subr.bf16.mxu1 %v2863_v46  ;;  %v2955_v45 = vld [vmem:[#allocation2 + $0x52c] ss:$16 sps:$4 sm:$0xff]   ;;  %v2950_v46 = vld [vmem:[#allocation2 + $0x520] ss:$16 sps:$4 sm:$0xff]  }
  0x90   :  { %1701 = vmatpush1.bf16.msra.mxu0 %v2858_v47  ;;  %1865 = vmatpush1.bf16.msra.mxu1 %v2861_v48  ;;  %v2953_v47 = vld [vmem:[#allocation2 + $0x528] ss:$16 sps:$4 sm:$0xff]   ;;  %v2958_v48 = vld [vmem:[#allocation2 + $0x544] ss:$16 sps:$4 sm:$0xff]  }
  0x91   :  { %1702 = vmatprep.subr.bf16.mxu0 %v2866_v49  ;;  %1866 = vmatprep.subr.bf16.mxu1 %v2869_v50  ;;  %v2961_v49 = vld [vmem:[#allocation2 + $0x54c] ss:$16 sps:$4 sm:$0xff]   ;;  %v2956_v50 = vld [vmem:[#allocation2 + $0x540] ss:$16 sps:$4 sm:$0xff]  }
  0x94   :  { %1703 = vmatpush1.bf16.msra.mxu0 %v2864_v51  ;;  %1867 = vmatpush1.bf16.msra.mxu1 %v2867_v52  ;;  %v2959_v51 = vld [vmem:[#allocation2 + $0x548] ss:$16 sps:$4 sm:$0xff]   ;;  %v2964_v52 = vld [vmem:[#allocation2 + $0x564] ss:$16 sps:$4 sm:$0xff]  }
  0x95   :  { %1704 = vmatprep.subr.bf16.mxu0 %v2872_v53  ;;  %1868 = vmatprep.subr.bf16.mxu1 %v2875_v54  ;;  %v2967_v53 = vld [vmem:[#allocation2 + $0x56c] ss:$16 sps:$4 sm:$0xff]   ;;  %v2962_v54 = vld [vmem:[#allocation2 + $0x560] ss:$16 sps:$4 sm:$0xff]  }
  0x98   :  { %1705 = vmatpush1.bf16.msra.mxu0 %v2870_v55  ;;  %1869 = vmatpush1.bf16.msra.mxu1 %v2873_v56  ;;  %v2965_v55 = vld [vmem:[#allocation2 + $0x568] ss:$16 sps:$4 sm:$0xff]   ;;  %v2970_v56 = vld [vmem:[#allocation2 + $0x584] ss:$16 sps:$4 sm:$0xff]  }
  0x99   :  { %1706 = vmatprep.subr.bf16.mxu0 %v2878_v57  ;;  %1870 = vmatprep.subr.bf16.mxu1 %v2881_v58  ;;  %v2973_v57 = vld [vmem:[#allocation2 + $0x58c] ss:$16 sps:$4 sm:$0xff]   ;;  %v2968_v58 = vld [vmem:[#allocation2 + $0x580] ss:$16 sps:$4 sm:$0xff]  }
  0x9c   :  { %1707 = vmatpush1.bf16.msra.mxu0 %v2876_v59  ;;  %1871 = vmatpush1.bf16.msra.mxu1 %v2879_v60  ;;  %v2971_v59 = vld [vmem:[#allocation2 + $0x588] ss:$16 sps:$4 sm:$0xff]   ;;  %v2976_v60 = vld [vmem:[#allocation2 + $0x5a4] ss:$16 sps:$4 sm:$0xff]  }
  0x9d   :  { %1708 = vmatprep.subr.bf16.mxu0 %v2884_v61  ;;  %1872 = vmatprep.subr.bf16.mxu1 %v2887_v62  ;;  %v2979_v61 = vld [vmem:[#allocation2 + $0x5ac] ss:$16 sps:$4 sm:$0xff]   ;;  %v2974_v62 = vld [vmem:[#allocation2 + $0x5a0] ss:$16 sps:$4 sm:$0xff]  }
  0xa0   :  { %1709 = vmatpush1.bf16.msra.mxu0 %v2882_v63  ;;  %1873 = vmatpush1.bf16.msra.mxu1 %v2885_v0  ;;  %v2977_v63 = vld [vmem:[#allocation2 + $0x5a8] ss:$16 sps:$4 sm:$0xff]   ;;  %v2982_v0 = vld [vmem:[#allocation2 + $0x5c4] ss:$16 sps:$4 sm:$0xff]  }
  0xa1   :  { %1710 = vmatprep.subr.bf16.mxu0 %v2890_v1  ;;  %1874 = vmatprep.subr.bf16.mxu1 %v2893_v2  ;;  %v2985_v1 = vld [vmem:[#allocation2 + $0x5cc] ss:$16 sps:$4 sm:$0xff]   ;;  %v2980_v2 = vld [vmem:[#allocation2 + $0x5c0] ss:$16 sps:$4 sm:$0xff]  }
  0xa4   :  { %1711 = vmatpush1.bf16.msra.mxu0 %v2888_v3  ;;  %1875 = vmatpush1.bf16.msra.mxu1 %v2891_v4  ;;  %v2983_v3 = vld [vmem:[#allocation2 + $0x5c8] ss:$16 sps:$4 sm:$0xff]   ;;  %v2988_v4 = vld [vmem:[#allocation2 + $0x5e4] ss:$16 sps:$4 sm:$0xff]  }
  0xa5   :  { %1721 = vmatprep.subr.bf16.mxu0 %v2898_v5  ;;  %1885 = vmatprep.subr.bf16.mxu1 %v2901_v6  ;;  %v2991_v5 = vld [vmem:[#allocation2 + $0x5ec] ss:$16 sps:$4 sm:$0xff]   ;;  %v2986_v6 = vld [vmem:[#allocation2 + $0x5e0] ss:$16 sps:$4 sm:$0xff]  }
  0xa7   :  { %1713 = vmatmul.mubr.bf16.vlgmr.msra.gmra.mrb[0].mxu0 %v2327_v7  ;;  %1877 = vmatmul.mubr.bf16.vlgmr.msra.gmra.mrb[0].mxu1 %v2327_v7  ;;  %v2989_v7 = vld [vmem:[#allocation2 + $0x5e8] ss:$16 sps:$4 sm:$0xff]  }
  0xa8   :  { %1722 = vmatpush1.bf16.msra.mxu0 %v2896_v8  ;;  %1886 = vmatpush1.bf16.msra.mxu1 %v2899_v9  ;;  %v2996_v8 = vld [vmem:[#allocation2 + $0x604] ss:$16 sps:$4 sm:$0xff]   ;;  %v2999_v9 = vld [vmem:[#allocation2 + $0x60c] ss:$16 sps:$4 sm:$0xff]  }
  0xa9   :  { %1723 = vmatprep.subr.bf16.mxu0 %v2904_v10  ;;  %1887 = vmatprep.subr.bf16.mxu1 %v2907_v12  ;;  %v2994_v10 = vld [vmem:[#allocation2 + $0x600] ss:$16 sps:$4 sm:$0xff]   ;;  %v2997_v12 = vld [vmem:[#allocation2 + $0x608] ss:$16 sps:$4 sm:$0xff]  }
  0xaa   :  { %1753 = vmatprep.mubr.bf16.mxu0 %v2330_v13  ;;  %1917 = vmatprep.mubr.bf16.mxu1 %v2330_v13  ;;  %v2329_v13 = vcombine.low %v3247_v11, %v3247_v11  ;;  %v3011_v11 = vld [vmem:[#allocation2 + $0x64c] ss:$16 sps:$4 sm:$0xff]  }
  0xac   :  { %1724 = vmatpush1.bf16.msra.mxu0 %v2902_v14  ;;  %1888 = vmatpush1.bf16.msra.mxu1 %v2905_v15  ;;  %v3256_v14 = vld [vmem:[%s3271_s0 + $0x18] sm:$0xff]  ;;  %v3002_v15 = vld [vmem:[#allocation2 + $0x624] ss:$16 sps:$4 sm:$0xff]  }
  0xad   :  { %1725 = vmatprep.subr.bf16.mxu0 %v2910_v16  ;;  %1889 = vmatprep.subr.bf16.mxu1 %v2913_v17  ;;  %v3005_v16 = vld [vmem:[#allocation2 + $0x62c] ss:$16 sps:$4 sm:$0xff]   ;;  %v3000_v17 = vld [vmem:[#allocation2 + $0x620] ss:$16 sps:$4 sm:$0xff]  }
  0xb0   :  { %1726 = vmatpush1.bf16.msra.mxu0 %v2908_v18  ;;  %1890 = vmatpush1.bf16.msra.mxu1 %v2911_v19  ;;  %v3003_v18 = vld [vmem:[#allocation2 + $0x628] ss:$16 sps:$4 sm:$0xff]   ;;  %v2332_v19 = vcombine.high %v3256_v14, %v3256_v14 }
  0xb1   :  { %1727 = vmatprep.subr.bf16.mxu0 %v2916_v20  ;;  %1891 = vmatprep.subr.bf16.mxu1 %v2919_v21  ;;  %v3008_v20 = vld [vmem:[#allocation2 + $0x644] ss:$16 sps:$4 sm:$0xff]   ;;  %v3006_v21 = vld [vmem:[#allocation2 + $0x640] ss:$16 sps:$4 sm:$0xff]  }
  0xb4   :  { %1728 = vmatpush1.bf16.msra.mxu0 %v2914_v22  ;;  %1892 = vmatpush1.bf16.msra.mxu1 %v2917_v23  ;;  %v3009_v22 = vld [vmem:[#allocation2 + $0x648] ss:$16 sps:$4 sm:$0xff]   ;;  %v3014_v23 = vld [vmem:[#allocation2 + $0x664] ss:$16 sps:$4 sm:$0xff]  }
  0xb5   :  { %1729 = vmatprep.subr.bf16.mxu0 %v2922_v24  ;;  %1893 = vmatprep.subr.bf16.mxu1 %v2925_v25  ;;  %v3017_v24 = vld [vmem:[#allocation2 + $0x66c] ss:$16 sps:$4 sm:$0xff]   ;;  %v3012_v25 = vld [vmem:[#allocation2 + $0x660] ss:$16 sps:$4 sm:$0xff]  }
  0xb8   :  { %1730 = vmatpush1.bf16.msra.mxu0 %v2920_v26  ;;  %1894 = vmatpush1.bf16.msra.mxu1 %v2923_v27  ;;  %v3015_v26 = vld [vmem:[#allocation2 + $0x668] ss:$16 sps:$4 sm:$0xff]   ;;  %v3020_v27 = vld [vmem:[#allocation2 + $0x684] ss:$16 sps:$4 sm:$0xff]  }
  0xb9   :  { %1731 = vmatprep.subr.bf16.mxu0 %v2928_v28  ;;  %1895 = vmatprep.subr.bf16.mxu1 %v2931_v29  ;;  %v3023_v28 = vld [vmem:[#allocation2 + $0x68c] ss:$16 sps:$4 sm:$0xff]   ;;  %v3018_v29 = vld [vmem:[#allocation2 + $0x680] ss:$16 sps:$4 sm:$0xff]  }
  0xbc   :  { %1732 = vmatpush1.bf16.msra.mxu0 %v2926_v30  ;;  %1896 = vmatpush1.bf16.msra.mxu1 %v2929_v31  ;;  %v3021_v30 = vld [vmem:[#allocation2 + $0x688] ss:$16 sps:$4 sm:$0xff]   ;;  %v3026_v31 = vld [vmem:[#allocation2 + $0x6a4] ss:$16 sps:$4 sm:$0xff]  }
  0xbd   :  { %1733 = vmatprep.subr.bf16.mxu0 %v2934_v32  ;;  %1897 = vmatprep.subr.bf16.mxu1 %v2937_v33  ;;  %v3029_v32 = vld [vmem:[#allocation2 + $0x6ac] ss:$16 sps:$4 sm:$0xff]   ;;  %v3024_v33 = vld [vmem:[#allocation2 + $0x6a0] ss:$16 sps:$4 sm:$0xff]  }
  0xc0   :  { %1734 = vmatpush1.bf16.msra.mxu0 %v2932_v34  ;;  %1898 = vmatpush1.bf16.msra.mxu1 %v2935_v35  ;;  %v3027_v34 = vld [vmem:[#allocation2 + $0x6a8] ss:$16 sps:$4 sm:$0xff]   ;;  %v3032_v35 = vld [vmem:[#allocation2 + $0x6c4] ss:$16 sps:$4 sm:$0xff]  }
  0xc1   :  { %1735 = vmatprep.subr.bf16.mxu0 %v2940_v36  ;;  %1899 = vmatprep.subr.bf16.mxu1 %v2943_v37  ;;  %v3035_v36 = vld [vmem:[#allocation2 + $0x6cc] ss:$16 sps:$4 sm:$0xff]   ;;  %v3030_v37 = vld [vmem:[#allocation2 + $0x6c0] ss:$16 sps:$4 sm:$0xff]  }
  0xc4   :  { %1736 = vmatpush1.bf16.msra.mxu0 %v2938_v38  ;;  %1900 = vmatpush1.bf16.msra.mxu1 %v2941_v39  ;;  %v3033_v38 = vld [vmem:[#allocation2 + $0x6c8] ss:$16 sps:$4 sm:$0xff]   ;;  %v3038_v39 = vld [vmem:[#allocation2 + $0x6e4] ss:$16 sps:$4 sm:$0xff]  }
  0xc5   :  { %1737 = vmatprep.subr.bf16.mxu0 %v2946_v40  ;;  %1901 = vmatprep.subr.bf16.mxu1 %v2949_v41  ;;  %v3041_v40 = vld [vmem:[#allocation2 + $0x6ec] ss:$16 sps:$4 sm:$0xff]   ;;  %v3036_v41 = vld [vmem:[#allocation2 + $0x6e0] ss:$16 sps:$4 sm:$0xff]  }
  0xc8   :  { %1738 = vmatpush1.bf16.msra.mxu0 %v2944_v42  ;;  %1902 = vmatpush1.bf16.msra.mxu1 %v2947_v43  ;;  %v3039_v42 = vld [vmem:[#allocation2 + $0x6e8] ss:$16 sps:$4 sm:$0xff]   ;;  %v3044_v43 = vld [vmem:[#allocation2 + $0x704] ss:$16 sps:$4 sm:$0xff]  }
  0xc9   :  { %1739 = vmatprep.subr.bf16.mxu0 %v2952_v44  ;;  %1903 = vmatprep.subr.bf16.mxu1 %v2955_v45  ;;  %v3047_v44 = vld [vmem:[#allocation2 + $0x70c] ss:$16 sps:$4 sm:$0xff]   ;;  %v3042_v45 = vld [vmem:[#allocation2 + $0x700] ss:$16 sps:$4 sm:$0xff]  }
  0xcc   :  { %1740 = vmatpush1.bf16.msra.mxu0 %v2950_v46  ;;  %1904 = vmatpush1.bf16.msra.mxu1 %v2953_v47  ;;  %v3045_v46 = vld [vmem:[#allocation2 + $0x708] ss:$16 sps:$4 sm:$0xff]   ;;  %v3050_v47 = vld [vmem:[#allocation2 + $0x724] ss:$16 sps:$4 sm:$0xff]  }
  0xcd   :  { %1741 = vmatprep.subr.bf16.mxu0 %v2958_v48  ;;  %1905 = vmatprep.subr.bf16.mxu1 %v2961_v49  ;;  %v3053_v48 = vld [vmem:[#allocation2 + $0x72c] ss:$16 sps:$4 sm:$0xff]   ;;  %v3048_v49 = vld [vmem:[#allocation2 + $0x720] ss:$16 sps:$4 sm:$0xff]  }
  0xd0   :  { %1742 = vmatpush1.bf16.msra.mxu0 %v2956_v50  ;;  %1906 = vmatpush1.bf16.msra.mxu1 %v2959_v51  ;;  %v3051_v50 = vld [vmem:[#allocation2 + $0x728] ss:$16 sps:$4 sm:$0xff]   ;;  %v3056_v51 = vld [vmem:[#allocation2 + $0x744] ss:$16 sps:$4 sm:$0xff]  }
  0xd1   :  { %1743 = vmatprep.subr.bf16.mxu0 %v2964_v52  ;;  %1907 = vmatprep.subr.bf16.mxu1 %v2967_v53  ;;  %v3059_v52 = vld [vmem:[#allocation2 + $0x74c] ss:$16 sps:$4 sm:$0xff]   ;;  %v3054_v53 = vld [vmem:[#allocation2 + $0x740] ss:$16 sps:$4 sm:$0xff]  }
  0xd4   :  { %1744 = vmatpush1.bf16.msra.mxu0 %v2962_v54  ;;  %1908 = vmatpush1.bf16.msra.mxu1 %v2965_v55  ;;  %v3057_v54 = vld [vmem:[#allocation2 + $0x748] ss:$16 sps:$4 sm:$0xff]   ;;  %v3062_v55 = vld [vmem:[#allocation2 + $0x764] ss:$16 sps:$4 sm:$0xff]  }
  0xd5   :  { %1745 = vmatprep.subr.bf16.mxu0 %v2970_v56  ;;  %1909 = vmatprep.subr.bf16.mxu1 %v2973_v57  ;;  %v3065_v56 = vld [vmem:[#allocation2 + $0x76c] ss:$16 sps:$4 sm:$0xff]   ;;  %v3060_v57 = vld [vmem:[#allocation2 + $0x760] ss:$16 sps:$4 sm:$0xff]  }
  0xd8   :  { %1746 = vmatpush1.bf16.msra.mxu0 %v2968_v58  ;;  %1910 = vmatpush1.bf16.msra.mxu1 %v2971_v59  ;;  %v3063_v58 = vld [vmem:[#allocation2 + $0x768] ss:$16 sps:$4 sm:$0xff]   ;;  %v3068_v59 = vld [vmem:[#allocation2 + $0x784] ss:$16 sps:$4 sm:$0xff]  }
  0xd9   :  { %1747 = vmatprep.subr.bf16.mxu0 %v2976_v60  ;;  %1911 = vmatprep.subr.bf16.mxu1 %v2979_v61  ;;  %v3071_v60 = vld [vmem:[#allocation2 + $0x78c] ss:$16 sps:$4 sm:$0xff]   ;;  %v3066_v61 = vld [vmem:[#allocation2 + $0x780] ss:$16 sps:$4 sm:$0xff]  }
  0xdc   :  { %1748 = vmatpush1.bf16.msra.mxu0 %v2974_v62  ;;  %1912 = vmatpush1.bf16.msra.mxu1 %v2977_v63  ;;  %v3069_v62 = vld [vmem:[#allocation2 + $0x788] ss:$16 sps:$4 sm:$0xff]   ;;  %v3074_v63 = vld [vmem:[#allocation2 + $0x7a4] ss:$16 sps:$4 sm:$0xff]  }
  0xdd   :  { %1749 = vmatprep.subr.bf16.mxu0 %v2982_v0  ;;  %1913 = vmatprep.subr.bf16.mxu1 %v2985_v1  ;;  %v3077_v0 = vld [vmem:[#allocation2 + $0x7ac] ss:$16 sps:$4 sm:$0xff]   ;;  %v3072_v1 = vld [vmem:[#allocation2 + $0x7a0] ss:$16 sps:$4 sm:$0xff]  }
  0xe0   :  { %1750 = vmatpush1.bf16.msra.mxu0 %v2980_v2  ;;  %1914 = vmatpush1.bf16.msra.mxu1 %v2983_v3  ;;  %v3075_v2 = vld [vmem:[#allocation2 + $0x7a8] ss:$16 sps:$4 sm:$0xff]   ;;  %v3080_v3 = vld [vmem:[#allocation2 + $0x7c4] ss:$16 sps:$4 sm:$0xff]  }
  0xe1   :  { %1751 = vmatprep.subr.bf16.mxu0 %v2988_v4  ;;  %1915 = vmatprep.subr.bf16.mxu1 %v2991_v5  ;;  %v3083_v4 = vld [vmem:[#allocation2 + $0x7cc] ss:$16 sps:$4 sm:$0xff]   ;;  %v3078_v5 = vld [vmem:[#allocation2 + $0x7c0] ss:$16 sps:$4 sm:$0xff]  }
  0xe4   :  { %1752 = vmatpush1.bf16.msra.mxu0 %v2986_v6  ;;  %1916 = vmatpush1.bf16.msra.mxu1 %v2989_v7  ;;  %v3081_v6 = vld [vmem:[#allocation2 + $0x7c8] ss:$16 sps:$4 sm:$0xff]   ;;  %v3086_v7 = vld [vmem:[#allocation2 + $0x7e4] ss:$16 sps:$4 sm:$0xff]  }
  0xe5   :  { %1762 = vmatprep.subr.bf16.mxu0 %v2996_v8  ;;  %1926 = vmatprep.subr.bf16.mxu1 %v2999_v9  ;;  %v3089_v8 = vld [vmem:[#allocation2 + $0x7ec] ss:$16 sps:$4 sm:$0xff]   ;;  %v3084_v9 = vld [vmem:[#allocation2 + $0x7e0] ss:$16 sps:$4 sm:$0xff]  }
  0xe7   :  { %1754 = vmatmul.mubr.bf16.vlgmr.msra.gmra.mrb[0].mxu0 %v2329_v13  ;;  %1918 = vmatmul.mubr.bf16.vlgmr.msra.gmra.mrb[0].mxu1 %v2329_v13  ;;  %v3093_v13 = vld [vmem:[#allocation4 + $0xc0] sm:$0xff]  }
  0xe8   :  { %1763 = vmatpush1.bf16.msra.mxu0 %v2994_v10  ;;  %1927 = vmatpush1.bf16.msra.mxu1 %v2997_v12  ;;  %v3087_v10 = vld [vmem:[#allocation2 + $0x7e8] ss:$16 sps:$4 sm:$0xff]   ;;  %v3092_v12 = vld [vmem:[#allocation4 + $0x40] sm:$0xff]  }
  0xe9   :  { %1764 = vmatprep.subr.bf16.mxu0 %v3002_v15  ;;  %1928 = vmatprep.subr.bf16.mxu1 %v3005_v16  ;;  %v2331_v15 = vcombine.low %v3256_v14, %v3256_v14  ;;  %v3094_v16 = vld [vmem:[#allocation4] sm:$0xff]   ;;  %v3102_v14 = vld [vmem:[#allocation4 + $0x10] sm:$0xff]  }
  0xea   :  { %1794 = vmatprep.mubr.bf16.mxu0 %v2332_v19  ;;  %1958 = vmatprep.mubr.bf16.mxu1 %v2332_v19  ;;  %v3097_v19 = vld [vmem:[#allocation4 + $0xc8] sm:$0xff]  }
  0xec   :  { %1765 = vmatpush1.bf16.msra.mxu0 %v3000_v17  ;;  %1929 = vmatpush1.bf16.msra.mxu1 %v3003_v18  ;;  %v3095_v17 = vld [vmem:[#allocation4 + $0x80] sm:$0xff]   ;;  %v3096_v18 = vld [vmem:[#allocation4 + $0x48] sm:$0xff]  }
  0xed   :  { %1766 = vmatprep.subr.bf16.mxu0 %v3008_v20  ;;  %1930 = vmatprep.subr.bf16.mxu1 %v3011_v11  ;;  %v3098_v20 = vld [vmem:[#allocation4 + $0x8] sm:$0xff]  }
  0xee   :  { %v3099_v11 = vld [vmem:[#allocation4 + $0x88] sm:$0xff]  }
  0xf0   :  { %1767 = vmatpush1.bf16.msra.mxu0 %v3006_v21  ;;  %1931 = vmatpush1.bf16.msra.mxu1 %v3009_v22  ;;  %v3100_v21 = vld [vmem:[#allocation4 + $0x50] sm:$0xff]  }
  0xf1   :  { %1768 = vmatprep.subr.bf16.mxu0 %v3014_v23  ;;  %1932 = vmatprep.subr.bf16.mxu1 %v3017_v24  ;;  %v3101_v22 = vld [vmem:[#allocation4 + $0xd0] sm:$0xff]   ;;  %v3104_v24 = vld [vmem:[#allocation4 + $0x58] sm:$0xff]  }
  0xf2   :  { %v3103_v23 = vld [vmem:[#allocation4 + $0x90] sm:$0xff]  }
  0xf4   :  { %1769 = vmatpush1.bf16.msra.mxu0 %v3012_v25  ;;  %1933 = vmatpush1.bf16.msra.mxu1 %v3015_v26  ;;  %v3105_v25 = vld [vmem:[#allocation4 + $0xd8] sm:$0xff]  }
  0xf5   :  { %1770 = vmatprep.subr.bf16.mxu0 %v3020_v27  ;;  %1934 = vmatprep.subr.bf16.mxu1 %v3023_v28  ;;  %v3106_v26 = vld [vmem:[#allocation4 + $0x18] sm:$0xff]   ;;  %v3108_v28 = vld [vmem:[#allocation4 + $0x60] sm:$0xff]  }
  0xf6   :  { %v3107_v27 = vld [vmem:[#allocation4 + $0x98] sm:$0xff]  }
  0xf8   :  { %1771 = vmatpush1.bf16.msra.mxu0 %v3018_v29  ;;  %1935 = vmatpush1.bf16.msra.mxu1 %v3021_v30  ;;  %v3109_v29 = vld [vmem:[#allocation4 + $0xe0] sm:$0xff]  }
  0xf9   :  { %1772 = vmatprep.subr.bf16.mxu0 %v3026_v31  ;;  %1936 = vmatprep.subr.bf16.mxu1 %v3029_v32  ;;  %v3110_v30 = vld [vmem:[#allocation4 + $0x20] sm:$0xff]   ;;  %v3112_v32 = vld [vmem:[#allocation4 + $0x68] sm:$0xff]  }
  0xfa   :  { %v3111_v31 = vld [vmem:[#allocation4 + $0xa0] sm:$0xff]  }
  0xfc   :  { %1773 = vmatpush1.bf16.msra.mxu0 %v3024_v33  ;;  %1937 = vmatpush1.bf16.msra.mxu1 %v3027_v34  ;;  %v3113_v33 = vld [vmem:[#allocation4 + $0xe8] sm:$0xff]  }
  0xfd   :  { %1774 = vmatprep.subr.bf16.mxu0 %v3032_v35  ;;  %1938 = vmatprep.subr.bf16.mxu1 %v3035_v36  ;;  %v3114_v34 = vld [vmem:[#allocation4 + $0x28] sm:$0xff]   ;;  %v3116_v36 = vld [vmem:[#allocation4 + $0x70] sm:$0xff]  }
  0xfe   :  { %v3115_v35 = vld [vmem:[#allocation4 + $0xa8] sm:$0xff]  }
 0x100   :  { %1775 = vmatpush1.bf16.msra.mxu0 %v3030_v37  ;;  %1939 = vmatpush1.bf16.msra.mxu1 %v3033_v38  ;;  %v3117_v37 = vld [vmem:[#allocation4 + $0xf0] sm:$0xff]  }
 0x101   :  { %1776 = vmatprep.subr.bf16.mxu0 %v3038_v39  ;;  %1940 = vmatprep.subr.bf16.mxu1 %v3041_v40  ;;  %v3118_v38 = vld [vmem:[#allocation4 + $0x30] sm:$0xff]   ;;  %v3120_v40 = vld [vmem:[#allocation4 + $0x78] sm:$0xff]  }
 0x102   :  { %v3119_v39 = vld [vmem:[#allocation4 + $0xb0] sm:$0xff]  }
 0x104   :  { %1777 = vmatpush1.bf16.msra.mxu0 %v3036_v41  ;;  %1941 = vmatpush1.bf16.msra.mxu1 %v3039_v42  ;;  %v3121_v41 = vld [vmem:[#allocation4 + $0xf8] sm:$0xff]  }
 0x105   :  { %1778 = vmatprep.subr.bf16.mxu0 %v3044_v43  ;;  %1942 = vmatprep.subr.bf16.mxu1 %v3047_v44  ;;  %v3122_v42 = vld [vmem:[#allocation4 + $0x38] sm:$0xff]   ;;  %v311_v44 = vlaneseq }
 0x106   :  { %v3123_v43 = vld [vmem:[#allocation4 + $0xb8] sm:$0xff]  }
 0x108   :  { %1779 = vmatpush1.bf16.msra.mxu0 %v3042_v45  ;;  %1943 = vmatpush1.bf16.msra.mxu1 %v3045_v46  ;;  %v312_v45 = vshrl.u32 %v311_v44, 7 }
 0x109   :  { %1780 = vmatprep.subr.bf16.mxu0 %v3050_v47  ;;  %1944 = vmatprep.subr.bf16.mxu1 %v3053_v48  ;;  %v309_v48 = vld [vmem:[%s3273_s2] sm:$0xf] }
 0x10a   :  { %v313_v46 = vsub.s32 0, %v312_v45  ;;  %v321_v47 = vsub.s32 2, %v312_v45 }
 0x10c   :  { %1781 = vmatpush1.bf16.msra.mxu0 %v3048_v49  ;;  %1945 = vmatpush1.bf16.msra.mxu1 %v3051_v50  ;;  %v317_v49 = vsub.s32 1, %v312_v45  ;;  %v325_v50 = vsub.s32 3, %v312_v45 }
 0x10d   :  { %1782 = vmatprep.subr.bf16.mxu0 %v3056_v51  ;;  %1946 = vmatprep.subr.bf16.mxu1 %v3059_v52  ;;  %v314_v51 = vrot.slane %v309_v48, %v313_v46  ;;  %v322_v52 = vrot.slane %v309_v48, %v321_v47 }
 0x110   :  { %1783 = vmatpush1.bf16.msra.mxu0 %v3054_v53  ;;  %1947 = vmatpush1.bf16.msra.mxu1 %v3057_v54  ;;  %v318_v53 = vrot.slane %v309_v48, %v317_v49  ;;  %v326_v54 = vrot.slane %v309_v48, %v325_v50 }
 0x111   :  { %1784 = vmatprep.subr.bf16.mxu0 %v3062_v55  ;;  %1948 = vmatprep.subr.bf16.mxu1 %v3065_v56 }
 0x114   :  { %1785 = vmatpush1.bf16.msra.mxu0 %v3060_v57  ;;  %1949 = vmatpush1.bf16.msra.mxu1 %v3063_v58 }
 0x115   :  { %1786 = vmatprep.subr.bf16.mxu0 %v3068_v59  ;;  %1950 = vmatprep.subr.bf16.mxu1 %v3071_v60 }
 0x118   :  { %1787 = vmatpush1.bf16.msra.mxu0 %v3066_v61  ;;  %1951 = vmatpush1.bf16.msra.mxu1 %v3069_v62 }
 0x119   :  { %1788 = vmatprep.subr.bf16.mxu0 %v3074_v63  ;;  %1952 = vmatprep.subr.bf16.mxu1 %v3077_v0 }
 0x11c   :  { %1789 = vmatpush1.bf16.msra.mxu0 %v3072_v1  ;;  %1953 = vmatpush1.bf16.msra.mxu1 %v3075_v2 }
 0x11d   :  { %1790 = vmatprep.subr.bf16.mxu0 %v3080_v3  ;;  %1954 = vmatprep.subr.bf16.mxu1 %v3083_v4 }
 0x120   :  { %1791 = vmatpush1.bf16.msra.mxu0 %v3078_v5  ;;  %1955 = vmatpush1.bf16.msra.mxu1 %v3081_v6 }
 0x121   :  { %1792 = vmatprep.subr.bf16.mxu0 %v3086_v7  ;;  %1956 = vmatprep.subr.bf16.mxu1 %v3089_v8 }
 0x124   :  { %1793 = vmatpush1.bf16.msra.mxu0 %v3084_v9  ;;  %1957 = vmatpush1.bf16.msra.mxu1 %v3087_v10 }
 0x125   :  { %2622 = vmatprep.subr.bf16.mxu0 %v3092_v12  ;;  %2644 = vmatprep.subr.bf16.mxu1 %v3093_v13 }
 0x127   :  { %1795 = vmatmul.mubr.bf16.vlgmr.msra.gmra.mrb[0].mxu0 %v2331_v15  ;;  %1959 = vmatmul.mubr.bf16.vlgmr.msra.gmra.mrb[0].mxu1 %v2331_v15  ;;  %v2589_v15 = vld [vmem:[%s3275_s4] ss:$0 sm:$0xff] }
 0x128   :  { %2623 = vmatpush3.bf16.msra.mxu0 %v3094_v16  ;;  %2645 = vmatpush3.bf16.msra.mxu1 %v3095_v17 }
 0x129   :  { %2624 = vmatprep.subr.bf16.mxu0 %v3096_v18  ;;  %2646 = vmatprep.subr.bf16.mxu1 %v3097_v19 }
 0x12c   :  { %2625 = vmatpush3.bf16.msra.mxu0 %v3098_v20  ;;  %2647 = vmatpush3.bf16.msra.mxu1 %v3099_v11 }
 0x12d   :  { %2626 = vmatprep.subr.bf16.mxu0 %v3100_v21  ;;  %2648 = vmatprep.subr.bf16.mxu1 %v3101_v22 }
 0x130   :  { %2627 = vmatpush3.bf16.msra.mxu0 %v3102_v14  ;;  %2649 = vmatpush3.bf16.msra.mxu1 %v3103_v23 }
 0x131   :  { %2628 = vmatprep.subr.bf16.mxu0 %v3104_v24  ;;  %2650 = vmatprep.subr.bf16.mxu1 %v3105_v25 }
 0x134   :  { %2629 = vmatpush3.bf16.msra.mxu0 %v3106_v26  ;;  %2651 = vmatpush3.bf16.msra.mxu1 %v3107_v27 }
 0x135   :  { %2630 = vmatprep.subr.bf16.mxu0 %v3108_v28  ;;  %2652 = vmatprep.subr.bf16.mxu1 %v3109_v29 }
 0x138   :  { %2631 = vmatpush3.bf16.msra.mxu0 %v3110_v30  ;;  %2653 = vmatpush3.bf16.msra.mxu1 %v3111_v31 }
 0x139   :  { %2632 = vmatprep.subr.bf16.mxu0 %v3112_v32  ;;  %2654 = vmatprep.subr.bf16.mxu1 %v3113_v33 }
 0x13c   :  { %2633 = vmatpush3.bf16.msra.mxu0 %v3114_v34  ;;  %2655 = vmatpush3.bf16.msra.mxu1 %v3115_v35 }
 0x13d   :  { %2634 = vmatprep.subr.bf16.mxu0 %v3116_v36  ;;  %2656 = vmatprep.subr.bf16.mxu1 %v3117_v37 }
 0x140   :  { %2635 = vmatpush3.bf16.msra.mxu0 %v3118_v38  ;;  %2657 = vmatpush3.bf16.msra.mxu1 %v3119_v39 }
 0x141   :  { %2636 = vmatprep.subr.bf16.mxu0 %v3120_v40  ;;  %2658 = vmatprep.subr.bf16.mxu1 %v3121_v41 }
 0x144   :  { %2637 = vmatpush3.bf16.msra.mxu0 %v3122_v42  ;;  %2659 = vmatpush3.bf16.msra.mxu1 %v3123_v43 }
 0x1fa   :  { %v1796_v55 = vpop.f32.mrb[0].mxu0  ;;  %v1960_v56 = vpop.f32.mrb[0].mxu1 }
 0x1fb   :  { %v2666_v57 = vadd.f32 %v1796_v55, %v314_v51  ;;  %v2668_v58 = vadd.f32 %v1960_v56, %v322_v52  ;;  %v1798_v59 = vpop.f32.mrb[1].mxu0  ;;  %v1962_v60 = vpop.f32.mrb[1].mxu1 }
 0x1fc   :  { %v2667_v61 = vadd.f32 %v1798_v59, %v318_v53  ;;  %v2669_v62 = vadd.f32 %v1962_v60, %v326_v54  ;;  %v1800_v63 = vpop.f32.mrb[2].mxu0  ;;  %v1964_v0 = vpop.f32.mrb[2].mxu1 }
 0x1fd   :  { %v1967_v1 = vmax.f32 %v2666_v57, 0.0  ;;  %v1969_v2 = vmax.f32 %v2668_v58, 0.0  ;;  %v1801_v3 = vpop.f32.mrb[3].mxu0  ;;  %v1965_v4 = vpop.f32.mrb[3].mxu1 }
 0x1fe   :  { %v1968_v5 = vmax.f32 %v2667_v61, 0.0  ;;  %v1970_v6 = vmax.f32 %v2669_v62, 0.0 }
 0x1ff   :  { %v1971_v9 = vpack.c.bf16 %v1967_v1, %v1967_v1  ;;  %v1973_v10 = vpack.c.bf16 %v1969_v2, %v1969_v2 }
 0x200   :  { %v1972_v7 = vpack.c.bf16 %v1968_v5, %v1968_v5  ;;  %v1974_v8 = vpack.c.bf16 %v1970_v6, %v1970_v6 }
 0x202   :  { %2270 = vmatprep.mubr.bf16.mxu0 %v1972_v7  ;;  %2310 = vmatprep.mubr.bf16.mxu1 %v1974_v8 }
 0x203   :  { %2271 = vmatmul.mubr.bf16.vlgmr.msra.gmra.mrb[4].mxu0 %v1971_v9  ;;  %2311 = vmatmul.mubr.bf16.vlgmr.msra.gmra.mrb[4].mxu1 %v1973_v10 }
 0x2d6   :  { %v2638_v12 = vpop.f32.mrb[4].mxu0  ;;  %v2660_v13 = vpop.f32.mrb[4].mxu1 }
 0x2d7   :  { %v2639_v16 = vpop.f32.mrb[5].mxu0  ;;  %v2661_v17 = vpop.f32.mrb[5].mxu1 }
 0x2d8   :  { %v2640_v18 = vadd.f32 %v2639_v16, %v2638_v12  ;;  %v2662_v19 = vadd.f32 %v2661_v17, %v2660_v13  ;;  %v2641_v20 = vpop.f32.mrb[6].mxu0  ;;  %v2663_v11 = vpop.f32.mrb[6].mxu1 }
 0x2d9   :  { %v2642_v21 = vpop.f32.mrb[7].mxu0  ;;  %v2664_v22 = vpop.f32.mrb[7].mxu1 }
 0x2da   :  { %v2273_v14 = vadd.f32 %v2640_v18, %v2589_v15 }
 0x2dc   :  { %v2313_v23 = vadd.f32 %v2662_v19, %v2273_v14 }
 0x2de   :  { %2318 = vst [vmem:[%s3276_s5] sm:$0xff] %v2313_v23 }
 0x2df   :  { %2323 = vsyncpa [#allocation3], 1 }
 0x2e0   :  { %2324 = vsyncpa [#allocation5], 1 }

</bundles_post_ra>
